<compile_context>
chip_gen: v6e
topology: v6e:2x2x1
jax: 0.10.0
libtpu: 0.0.40
codegen_flags: <defaults>
</compile_context>

<pallas_src>
import jax
import jax.numpy as jnp
from jax.experimental import pallas as pl
from jax.experimental.pallas import tpu as pltpu


_LANES = 128
# 2048 rows * 128 lanes * 4 B = 1 MiB per f32 block per stream; with
# img + noise + out double-buffered that is ~6 MiB of VMEM.  We set the scoped
# VMEM limit explicitly below so this is safe on v5e/v6e/v7x.
_MAX_BLOCK_ROWS = 2048
_VMEM_LIMIT_BYTES = 32 << 20


def _largest_divisor(n, limit, multiple_of=1):
    """Largest divisor of n that is <= limit and a multiple of `multiple_of`.
    Returns 0 if no such divisor exists."""
    best = 0
    d = 1
    while d * d <= n:
        if n % d == 0:
            for c in (d, n // d):
                if c <= limit and c % multiple_of == 0 and c > best:
                    best = c
        d += 1
    return best


# -----------------------------------------------------------------------------
# Kernel: dense elementwise blend of one (b_tile, r_tile, 128) slab.
# s_ref / ms_ref are (b_tile, 1, 1) per-batch scalars and broadcast on the VPU.
# -----------------------------------------------------------------------------
def _diffuser_blend_kernel(s_ref, ms_ref, img_ref, noise_ref, out_ref):
    out_ref[...] = s_ref[...] * img_ref[...] + ms_ref[...] * noise_ref[...]


@jax.jit
def diffuser_forward(img, timesteps, noise, alpha_hat):
    """img: (B, C, H, W), timesteps: (B,) i32, noise: (B, C, H, W),
    alpha_hat: (T,) f32.  Returns (noisy_img, noise)."""
    B, C, H, W = img.shape
    chw = C * H * W

    # Per-batch schedule scalars: gather + sqrt in f32, then cast to the image
    # dtype (avoids computing sqrt at bf16 precision for bf16 inputs).
    a_t = alpha_hat[timesteps].astype(jnp.float32)                  # (B,)
    s = jnp.sqrt(a_t).astype(img.dtype).reshape(B, 1, 1)            # sqrt(alpha_hat[t])
    ms = jnp.sqrt(1.0 - a_t).astype(img.dtype).reshape(B, 1, 1)     # sqrt(1 - alpha_hat[t])

    itemsize = jnp.dtype(img.dtype).itemsize
    # Sublane packing factor: f32 -> 8, bf16 -> 16, int8/fp8 -> 32.
    sub = 8 * max(1, 4 // itemsize)

    # Lane-dense layout: (B, R, 128).  Pad the flattened image dim to a
    # multiple of 128 only if needed (no-op for shapes like 4*16*16 = 1024).
    chw_pad = ((chw + _LANES - 1) // _LANES) * _LANES
    R = chw_pad // _LANES

    def to_slab(x):
        x = x.reshape(B, chw)
        if chw_pad != chw:
            x = jnp.pad(x, ((0, 0), (0, chw_pad - chw)))
        return x.reshape(B, R, _LANES)

    img3 = to_slab(img)
    noise3 = to_slab(noise)

    # ------------------------------------------------------------------
    # Tile selection: biggest blocks within the row budget, no padding in
    # the common case, batch packing for small images.
    # ------------------------------------------------------------------
    R_pad = R
    if R <= _MAX_BLOCK_ROWS:
        # Full image rows in one block; pack as many batch images as fit.
        r_tile = R
        b_tile = _largest_divisor(B, max(1, _MAX_BLOCK_ROWS // R))
        b_tile = max(1, b_tile)
    else:
        # One image per block, split its rows with an exact divisor of R that
        # respects the sublane packing of the dtype.
        b_tile = 1
        r_tile = _largest_divisor(R, _MAX_BLOCK_ROWS, multiple_of=sub)
        if r_tile == 0:
            # Rare fallback: no aligned divisor -> pad R (extra HBM copy).
            # TODO(synk): replace with a masked partial last block.
            r_tile = _MAX_BLOCK_ROWS
            R_pad = -(-R // r_tile) * r_tile
            pad = ((0, 0), (0, R_pad - R), (0, 0))
            img3 = jnp.pad(img3, pad)
            noise3 = jnp.pad(noise3, pad)

    n_b = B // b_tile
    n_r = R_pad // r_tile

    # Megacore split (v7x): avoid a single grid step for non-trivial inputs so
    # both TensorCores can stream; keep each half-block >= ~256 KiB per stream.
    min_split_rows = 2 * ((256 * 1024) // (_LANES * itemsize))
    if n_b * n_r == 1 and b_tile * r_tile >= min_split_rows:
        if b_tile % 2 == 0:
            b_tile //= 2
        elif r_tile % (2 * sub) == 0:
            r_tile //= 2
        n_b = B // b_tile
        n_r = R_pad // r_tile

    scale_spec = pl.BlockSpec((b_tile, 1, 1), lambda b, r: (b, 0, 0))
    data_spec = pl.BlockSpec((b_tile, r_tile, _LANES), lambda b, r: (b, r, 0))

    out3 = pl.pallas_call(
        _diffuser_blend_kernel,
        out_shape=jax.ShapeDtypeStruct((B, R_pad, _LANES), img.dtype),
        grid=(n_b, n_r),
        in_specs=[scale_spec, scale_spec, data_spec, data_spec],
        out_specs=data_spec,
        compiler_params=pltpu.CompilerParams(
            dimension_semantics=("parallel", "parallel"),
            vmem_limit_bytes=_VMEM_LIMIT_BYTES),
    )(s, ms, img3, noise3)

    if R_pad != R:
        out3 = out3[:, :R, :]
    out_flat = out3.reshape(B, chw_pad)
    if chw_pad != chw:
        out_flat = out_flat[:, :chw]
    noisy = out_flat.reshape(B, C, H, W)

    # Return the input noise array directly -- no extra HBM traffic.
    return noisy, noise


def make_schedule(timesteps=1000, beta_start=1e-4, beta_end=0.02):
    """Deterministic schedule parameters (mirrors Diffuser.__init__)."""
    beta = jnp.linspace(beta_start, beta_end, timesteps, dtype=jnp.float32)
    alpha = 1.0 - beta
    alpha_hat = jnp.cumprod(alpha)
    return beta, alpha, alpha_hat


if __name__ == "__main__":
    T = 1000
    B, C, H, W = 2, 4, 16, 16

    _, _, alpha_hat = make_schedule(T)

    key = jax.random.PRNGKey(0)
    k_img, k_t, k_noise = jax.random.split(key, 3)
    img = jax.random.normal(k_img, (B, C, H, W), dtype=jnp.float32)
    timesteps = jax.random.randint(k_t, (B,), 0, T, dtype=jnp.int32)
    noise = jax.random.normal(k_noise, (B, C, H, W), dtype=jnp.float32)

    noisy, noise_out = diffuser_forward(img, timesteps, noise, alpha_hat)
    noisy = jax.block_until_ready(noisy)
    noise_out = jax.block_until_ready(noise_out)

    # Pure-JAX reference check.
    sah = jnp.sqrt(alpha_hat[timesteps])[:, None, None, None]
    msah = jnp.sqrt(1.0 - alpha_hat[timesteps])[:, None, None, None]
    ref = sah * img + msah * noise
    assert noisy.shape == (B, C, H, W) and noise_out.shape == (B, C, H, W)
    assert jnp.allclose(noisy, ref, atol=1e-5, rtol=1e-5)
    assert bool(jnp.array_equal(noise_out, noise))

    print("KERNEL_OK")
</pallas_src>

<mosaic_0001>
module attributes {stable_mosaic.version = 11 : i64} {
  func.func @_diffuser_blend_kernel(%arg0: i32, %arg1: i32, %arg2: memref<2x1x1xf32, #tpu.memory_space<vmem>>, %arg3: memref<2x1x1xf32, #tpu.memory_space<vmem>>, %arg4: memref<2x8x128xf32, #tpu.memory_space<vmem>>, %arg5: memref<2x8x128xf32, #tpu.memory_space<vmem>>, %arg6: memref<2x8x128xf32, #tpu.memory_space<vmem>>) attributes {dimension_semantics = [#tpu.dimension_semantics<parallel>, #tpu.dimension_semantics<parallel>], iteration_bounds = array<i64: 1, 1>, scalar_prefetch = 0 : i64, scratch_operands = 0 : i64, tpu.core_type = #tpu.core_type<tc>, window_params = [{transform_indices = @transform_0, window_bounds = array<i64: 2, 1, 1>}, {transform_indices = @transform_1, window_bounds = array<i64: 2, 1, 1>}, {transform_indices = @transform_2, window_bounds = array<i64: 2, 8, 128>}, {transform_indices = @transform_3, window_bounds = array<i64: 2, 8, 128>}, {transform_indices = @transform_4, window_bounds = array<i64: 2, 8, 128>}]} {
    %c0 = arith.constant 0 : index
    %c0_0 = arith.constant 0 : index
    %c0_1 = arith.constant 0 : index
    %0 = vector.load %arg2[%c0, %c0_0, %c0_1] : memref<2x1x1xf32, #tpu.memory_space<vmem>>, vector<2x1x1xf32>
    %c0_2 = arith.constant 0 : index
    %c0_3 = arith.constant 0 : index
    %c0_4 = arith.constant 0 : index
    %1 = vector.load %arg4[%c0_2, %c0_3, %c0_4] : memref<2x8x128xf32, #tpu.memory_space<vmem>>, vector<2x8x128xf32>
    %2 = vector.broadcast %0 : vector<2x1x1xf32> to vector<2x8x128xf32>
    %3 = arith.mulf %2, %1 : vector<2x8x128xf32>
    %c0_5 = arith.constant 0 : index
    %c0_6 = arith.constant 0 : index
    %c0_7 = arith.constant 0 : index
    %4 = vector.load %arg3[%c0_5, %c0_6, %c0_7] : memref<2x1x1xf32, #tpu.memory_space<vmem>>, vector<2x1x1xf32>
    %c0_8 = arith.constant 0 : index
    %c0_9 = arith.constant 0 : index
    %c0_10 = arith.constant 0 : index
    %5 = vector.load %arg5[%c0_8, %c0_9, %c0_10] : memref<2x8x128xf32, #tpu.memory_space<vmem>>, vector<2x8x128xf32>
    %6 = vector.broadcast %4 : vector<2x1x1xf32> to vector<2x8x128xf32>
    %7 = arith.mulf %6, %5 : vector<2x8x128xf32>
    %8 = arith.addf %3, %7 : vector<2x8x128xf32>
    %c0_11 = arith.constant 0 : index
    %c0_12 = arith.constant 0 : index
    %c0_13 = arith.constant 0 : index
    %9 = vector.load %arg6[%c0_11, %c0_12, %c0_13] : memref<2x8x128xf32, #tpu.memory_space<vmem>>, vector<2x8x128xf32>
    tpu.vector_store %arg6[%c0_11, %c0_12, %c0_13], %8 {strides = array<i32>} : memref<2x8x128xf32, #tpu.memory_space<vmem>>, vector<2x8x128xf32>,
    return
  }
  func.func @transform_0(%arg0: i32, %arg1: i32) -> (i32, i32, i32) {
    %c0_i32 = arith.constant 0 : i32
    %c0_i32_0 = arith.constant 0 : i32
    %c0_i32_1 = arith.constant 0 : i32
    return %arg0, %c0_i32, %c0_i32_0 : i32, i32, i32
  }
  func.func @transform_1(%arg0: i32, %arg1: i32) -> (i32, i32, i32) {
    %c0_i32 = arith.constant 0 : i32
    %c0_i32_0 = arith.constant 0 : i32
    %c0_i32_1 = arith.constant 0 : i32
    return %arg0, %c0_i32, %c0_i32_0 : i32, i32, i32
  }
  func.func @transform_2(%arg0: i32, %arg1: i32) -> (i32, i32, i32) {
    %c0_i32 = arith.constant 0 : i32
    %c0_i32_0 = arith.constant 0 : i32
    return %arg0, %arg1, %c0_i32 : i32, i32, i32
  }
  func.func @transform_3(%arg0: i32, %arg1: i32) -> (i32, i32, i32) {
    %c0_i32 = arith.constant 0 : i32
    %c0_i32_0 = arith.constant 0 : i32
    return %arg0, %arg1, %c0_i32 : i32, i32, i32
  }
  func.func @transform_4(%arg0: i32, %arg1: i32) -> (i32, i32, i32) {
    %c0_i32 = arith.constant 0 : i32
    %c0_i32_0 = arith.constant 0 : i32
    return %arg0, %arg1, %c0_i32 : i32, i32, i32
  }
}

</mosaic_0001>

<bundles_post_ra>
// kernel: diffuser_forward.1
= control target key start
LH: loop header
LB: loop body
LE: loop exit
PB: predicated region body
PF: predicated region fallthrough
CT: control target
= control target key end

     0   :  { %v80_v0 = vmov 0   ;;  %s136_s1 = inlined_call_operand.vmem [shape: f32[2,1,1], index: 1, kind: input, shape index: {}]   ;;  %s137_s0 = inlined_call_operand.vmem [shape: f32[2,1,1], index: 0, kind: input, shape index: {}]   ;;  %s138_s3 = inlined_call_operand.vmem [shape: f32[2,8,128], index: 3, kind: input, shape index: {}]   ;;  %s139_s2 = inlined_call_operand.vmem [shape: f32[2,8,128], index: 2, kind: input, shape index: {}]   ;;  %s140_s4 = inlined_call_operand.vmem [shape: f32[2,8,128], index: 4, kind: output, shape index: {}]  }
   0x1   :  { %79 = vset.pattern.permute.xlu1 %v80_v0  ;;  %78 = vset.pattern.permute.xlu0 %v80_v0  ;;  %v75_v1 = vld [vmem:[%s136_s1] ss:$0 sm:$0xff]  ;;  %v76_v3 = vld [vmem:[%s136_s1 + $0x1] ss:$0 sm:$0xff]  ;;  %v44_v11 = vld [vmem:[%s138_s3 + $0x8] sm:$0xff] }
   0x2   :  { %v73_v2 = vld [vmem:[%s137_s0] ss:$0 sm:$0xff]  ;;  %56 = vperm.xlu1 %79, %v75_v1   ;;  %v74_v4 = vld [vmem:[%s137_s0 + $0x1] ss:$0 sm:$0xff]  ;;  %v20_v12 = vld [vmem:[%s139_s2 + $0x8] sm:$0xff] }
   0x3   :  { %32 = vperm.xlu0 %78, %v73_v2   ;;  %v43_v5 = vld [vmem:[%s138_s3] sm:$0xff] }
   0x4   :  { %v19_v6 = vld [vmem:[%s139_s2] sm:$0xff] }
   0x6   :  { %60 = vperm.xlu1 %79, %v76_v3  }
   0x7   :  { %36 = vperm.xlu0 %78, %v74_v4  }
  0x7d   :  { %v57_v7 = vpop.permute.xlu1 %56 }
  0x7e   :  { %v33_v8 = vpop.permute.xlu0 %32  ;;  %v63_v9 = vmul.f32 %v57_v7, %v43_v5 }
  0x7f   :  { %v39_v10 = vmul.f32 %v33_v8, %v19_v6 }
  0x81   :  { %v65_v13 = vadd.f32 %v63_v9, %v39_v10  ;;  %v61_v14 = vpop.permute.xlu1 %60 }
  0x82   :  { %v37_v15 = vpop.permute.xlu0 %36  ;;  %v64_v16 = vmul.f32 %v61_v14, %v44_v11 }
  0x83   :  { %67 = vst [vmem:[%s140_s4] sm:$0xff] %v65_v13  ;;  %v40_v17 = vmul.f32 %v37_v15, %v20_v12 }
  0x85   :  { %v66_v18 = vadd.f32 %v64_v16, %v40_v17 }
  0x87   :  { %68 = vst [vmem:[%s140_s4 + $0x8] sm:$0xff] %v66_v18 }

</bundles_post_ra>
